<compile_context>
chip_gen: v7x
topology: tpu7x:2x2x1
jax: 0.10.0
libtpu: 0.0.40
codegen_flags: <defaults>
</compile_context>

<pallas_src>
import jax
import jax.numpy as jnp
from jax import lax
from jax.experimental import pallas as pl
from jax.experimental.pallas import tpu as pltpu

STATE_SIZE = 16                 # state_size = obs.shape[1]
HIDDEN_SIZE = 32
CATEGORICAL_SIZE = 256
INPUT_SIZE = STATE_SIZE + 1
OUTPUT_SIZE = STATE_SIZE * 2    # GRU hidden size ("output_size")
LOG2_S = 4
assert (1 << LOG2_S) == STATE_SIZE

# lane-aligned offsets inside the packed constant inputs (slices stay in-tile)
B_IH, B_HH, B_H1, B_H2, BIAS_W = 0, 128, 256, 320, 384
W_IH_COL, W_H1_COL, W_H2_COL = 0, 128, 256
W_SLAB = (64, 384)
OUT_ROWS = STATE_SIZE + 8       # 16 logits rows + one padded (8, C) tail tile

VMEM = pl.BlockSpec(memory_space=pltpu.MemorySpace.VMEM)


def _wm_fused_kernel(x_ref, g_ref, bias_ref, w_ref, dynw_ref, dynb_ref, out_ref):
    """GRU step + dyn_params + Gumbel-max categorical sample + reward/discount heads."""
    S, C, H, H2 = STATE_SIZE, CATEGORICAL_SIZE, HIDDEN_SIZE, OUTPUT_SIZE
    f32 = jnp.float32

    bias = bias_ref[...]                                           # (1, 384)
    b_ih = bias[:, B_IH:B_IH + 3 * H2]                             # (1, 96)
    b_hh = bias[:, B_HH:B_HH + 3 * H2]                             # (1, 96)
    b_h1 = bias[:, B_H1:B_H1 + 2 * H]                              # (1, 64)
    b_h2 = bias[:, B_H2:B_H2 + 3]                                  # (1, 3)

    # ---- single-step nn.GRU (gate order r, z, n), initial hidden h0 == 0 ----
    x = x_ref[...]                                                 # (1, S+1)
    w_ih = w_ref[0:INPUT_SIZE, W_IH_COL:W_IH_COL + 3 * H2]         # (17, 96)
    gi = jnp.dot(x, w_ih, preferred_element_type=f32) + b_ih       # (1, 96)
    gh = b_hh                     # h0 == 0  =>  h0 @ W_hh^T == 0, only b_hh left
    i_r, i_z, i_n = gi[:, :H2], gi[:, H2:2 * H2], gi[:, 2 * H2:]
    h_r, h_z, h_n = gh[:, :H2], gh[:, H2:2 * H2], gh[:, 2 * H2:]
    r = jax.nn.sigmoid(i_r + h_r)
    z = jax.nn.sigmoid(i_z + h_z)
    n = jnp.tanh(i_n + r * h_n)
    h = (1.0 - z) * n                                              # + z * h0, h0 == 0
    stoch, det = h[:, :S], h[:, S:]                                # (1, S), (1, S)

    # ---- dyn_params logits as one block-diagonal MXU matmul ----
    # rep[j,k] = (k % S == j)  replicates stoch along lanes (on the idle MXU);
    # blk[i,k] = (k // S == i) is the block-diagonal mask.  Both built from iota.
    row_jk = lax.broadcasted_iota(jnp.int32, (S, S * S), 0)
    col_jk = lax.broadcasted_iota(jnp.int32, (S, S * S), 1)
    rep = (jnp.bitwise_and(col_jk, S - 1) == row_jk).astype(f32)   # k % S == j
    blk = (jnp.right_shift(col_jk, LOG2_S) == row_jk).astype(f32)  # k // S == i
    stoch_rep = jnp.dot(stoch, rep, preferred_element_type=f32)    # (1, S*S)
    a_mat = jnp.broadcast_to(stoch_rep, (S, S * S)) * blk          # (S, S*S)
    logits = jnp.dot(a_mat.astype(jnp.bfloat16), dynw_ref[...],    # native bf16 MXU
                     preferred_element_type=f32) + dynb_ref[...]   # (S, C) f32

    # ---- Categorical(logits): Gumbel-max sample + log_prob ----
    cat_idx = lax.broadcasted_iota(jnp.int32, (S, C), 1)
    y = logits + g_ref[...]                                        # pre-drawn Gumbel noise
    y_max = jnp.max(y, axis=-1, keepdims=True)
    sample_col = jnp.min(jnp.where(y >= y_max, cat_idx, C),
                         axis=-1, keepdims=True)                   # (S, 1) int32
    l_max = jnp.max(logits, axis=-1, keepdims=True)
    lse = l_max + jnp.log(jnp.sum(jnp.exp(logits - l_max), axis=-1, keepdims=True))
    sel = jnp.sum(jnp.where(cat_idx == sample_col, logits, 0.0),
                  axis=-1, keepdims=True)
    logp_col = sel - lse                                           # (S, 1)

    # (S,1) columns -> one (1,2S) row with a single fused eye-masked sublane reduce:
    # sample lands in lanes [0:S), log_prob in lanes [S:2S) (their final positions).
    row2 = lax.broadcasted_iota(jnp.int32, (S, 2 * S), 0)
    col2 = lax.broadcasted_iota(jnp.int32, (S, 2 * S), 1)
    picked = (jnp.where(col2 == row2, sample_col.astype(f32), 0.0)
              + jnp.where(col2 == row2 + S, logp_col, 0.0))
    samp_logp = jnp.sum(picked, axis=0, keepdims=True)             # (1, 2S)
    sample_row = samp_logp[:, :S]                                  # (1, S) float index

    # ---- reward / discount heads on [deterministic, state_sample] ----
    # state_sample forward value == sample (straight-through).  Layer-1 of both
    # heads fused side by side; layer-2 block-diagonal -> [mu, sigma_raw, disc].
    w1 = w_ref[0:H2, W_H1_COL:W_H1_COL + 2 * H]                    # (32, 64)
    w2 = w_ref[0:2 * H, W_H2_COL:W_H2_COL + 3]                     # (64, 3)
    h_all = jnp.maximum(
        jnp.dot(det, w1[:S, :], preferred_element_type=f32)
        + jnp.dot(sample_row, w1[S:, :], preferred_element_type=f32)
        + b_h1, 0.0)                                               # (1, 2H)
    out3 = jnp.dot(h_all, w2, preferred_element_type=f32) + b_h2   # (1, 3)

    # ---- single lane-dense output slab; only full-tile unmasked stores ----
    tail = jnp.concatenate([
        jnp.concatenate([samp_logp, jnp.zeros((1, C - 2 * S), f32)], axis=1),  # row S
        jnp.concatenate([out3, jnp.zeros((1, C - 3), f32)], axis=1),           # row S+1
        jnp.zeros((6, C), f32),                                                # padding
    ], axis=0)                                                     # (8, C)
    out_ref[0:S, :] = logits
    out_ref[S:S + 8, :] = tail


def init_params(key):
    """PyTorch-default-like uniform init, pre-packed into kernel-friendly slabs."""
    S, C, H, IN, OUT = STATE_SIZE, CATEGORICAL_SIZE, HIDDEN_SIZE, INPUT_SIZE, OUTPUT_SIZE
    ks = jax.random.split(key, 14)

    def u(k, shape, fan_in):
        b = 1.0 / (fan_in ** 0.5)
        return jax.random.uniform(k, shape, jnp.float32, -b, b)

    w_ih = u(ks[0], (3 * OUT, IN), OUT)
    _w_hh = u(ks[1], (3 * OUT, OUT), OUT)    # unused in forward (h0 == 0), kept for parity
    b_ih = u(ks[2], (3 * OUT,), OUT)
    b_hh = u(ks[3], (3 * OUT,), OUT)
    dyn_w = u(ks[4], (S * C, S), S)
    dyn_b = u(ks[5], (S * C,), S)
    r1_w = u(ks[6], (H, OUT), OUT); r1_b = u(ks[7], (H,), OUT)
    r2_w = u(ks[8], (2, H), H);     r2_b = u(ks[9], (2,), H)
    d1_w = u(ks[10], (H, OUT), OUT); d1_b = u(ks[11], (H,), OUT)
    d2_w = u(ks[12], (1, H), H);     d2_b = u(ks[13], (1,), H)

    # packed constant bias row (lane-aligned offsets)
    bias_slab = jnp.zeros((1, BIAS_W), jnp.float32)
    bias_slab = bias_slab.at[0, B_IH:B_IH + 3 * OUT].set(b_ih)
    bias_slab = bias_slab.at[0, B_HH:B_HH + 3 * OUT].set(b_hh)
    bias_slab = bias_slab.at[0, B_H1:B_H1 + 2 * H].set(jnp.concatenate([r1_b, d1_b]))
    bias_slab = bias_slab.at[0, B_H2:B_H2 + 3].set(jnp.concatenate([r2_b, d2_b]))

    # packed constant weight slab: GRU input weights, fused head layer-1, head layer-2
    w_h2 = jnp.zeros((2 * H, 3), jnp.float32)
    w_h2 = w_h2.at[:H, 0:2].set(r2_w.T).at[H:, 2:3].set(d2_w.T)
    w_slab = jnp.zeros(W_SLAB, jnp.float32)
    w_slab = w_slab.at[0:IN, W_IH_COL:W_IH_COL + 3 * OUT].set(w_ih.T)
    w_slab = w_slab.at[0:OUT, W_H1_COL:W_H1_COL + 2 * H].set(
        jnp.concatenate([r1_w.T, d1_w.T], axis=1))
    w_slab = w_slab.at[0:2 * H, W_H2_COL:W_H2_COL + 3].set(w_h2)

    # B[i*S + j, c] = dyn_w[i*C + c, j]  (so logits = block_diag(stoch) @ B + b)
    dyn_w_bd = dyn_w.reshape(S, C, S).transpose(0, 2, 1).reshape(S * S, C)

    return {
        "bias_slab": bias_slab,
        "w_slab": w_slab,
        "dyn_w_bd": dyn_w_bd.astype(jnp.bfloat16),   # dominant HBM transfer halved
        "dyn_b_2d": dyn_b.reshape(S, C),             # bias kept in f32
    }


def world_model_forward(params, state_seq, action, key):
    S, C = STATE_SIZE, CATEGORICAL_SIZE
    x = jnp.concatenate([state_seq.astype(jnp.float32),
                         jnp.reshape(action, (1, 1)).astype(jnp.float32)], axis=1)
    # Gumbel noise drawn in the wrapper (no in-kernel PRNG).
    gumbel = jax.random.gumbel(key, (S, C), jnp.float32)

    # TODO(synk): when this is called inside a rollout loop, add a timestep/env
    # grid with constant-index weight BlockSpecs (and a 'parallel' env axis on
    # v7x) so the packed weights stay VMEM-resident instead of re-DMA'd per step.
    out = pl.pallas_call(
        _wm_fused_kernel,
        out_shape=jax.ShapeDtypeStruct((OUT_ROWS, C), jnp.float32),
        in_specs=[VMEM] * 6,
        out_specs=VMEM,
        cost_estimate=pl.CostEstimate(flops=2_300_000, transcendentals=4_300,
                                      bytes_accessed=300_000),
    )(x, gumbel, params["bias_slab"], params["w_slab"],
      params["dyn_w_bd"], params["dyn_b_2d"])

    logits = out[0:S, :]
    sample_f = out[S, 0:S].reshape(1, S)
    log_prob = out[S, S:2 * S].reshape(1, S)
    mu = out[S + 1, 0:1]
    sigma = jnp.maximum(out[S + 1, 1:2], 1e-5)          # .clamp(min=1e-5)
    disc = out[S + 1, 2:3]
    sample = sample_f.astype(jnp.int32)

    # TODO(synk): torch.distributions objects have no Pallas equivalent; we return
    # their defining parameters plus the in-kernel sample / log_prob.  The
    # straight-through estimator (sample + probs - probs.detach()) matches in
    # forward value only; no gradient flows through the sampled path without a
    # custom_vjp.
    return {
        "state_logits": logits.reshape(1, S, C),        # Categorical(logits=...)
        "state_sample": sample,
        "state_log_prob": log_prob,
        "reward_mu": mu,                                # Normal(loc, scale)
        "reward_sigma": sigma,
        "discount_logits": disc.reshape(1, 1),          # Bernoulli(logits=...)
    }


if __name__ == "__main__":
    key = jax.random.PRNGKey(0)
    pkey, skey, akey, gkey = jax.random.split(key, 4)
    params = init_params(pkey)
    state_seq = jax.random.normal(skey, (1, STATE_SIZE), jnp.float32)
    action = jax.random.normal(akey, (), jnp.float32)

    out = world_model_forward(params, state_seq, action, gkey)
    out = jax.block_until_ready(out)

    assert out["state_logits"].shape == (1, STATE_SIZE, CATEGORICAL_SIZE)
    assert out["state_sample"].shape == (1, STATE_SIZE)
    assert out["state_log_prob"].shape == (1, STATE_SIZE)
    assert int(out["state_sample"].min()) >= 0
    assert int(out["state_sample"].max()) < CATEGORICAL_SIZE
    assert bool(jnp.all(out["state_log_prob"] <= 0.0))
    assert float(out["reward_sigma"].min()) >= 1e-5
    assert bool(jnp.all(jnp.isfinite(out["state_logits"])))
    print("KERNEL_OK")
</pallas_src>

<mosaic_0001>
module attributes {stable_mosaic.version = 11 : i64} {
  func.func @_wm_fused_kernel(%arg0: memref<1x17xf32, #tpu.memory_space<vmem>>, %arg1: memref<16x256xf32, #tpu.memory_space<vmem>>, %arg2: memref<1x384xf32, #tpu.memory_space<vmem>>, %arg3: memref<64x384xf32, #tpu.memory_space<vmem>>, %arg4: memref<256x256xbf16, #tpu.memory_space<vmem>>, %arg5: memref<16x256xf32, #tpu.memory_space<vmem>>, %arg6: memref<24x256xf32, #tpu.memory_space<vmem>>) attributes {dimension_semantics = [], scalar_prefetch = 0 : i64, scratch_operands = 0 : i64, tpu.core_type = #tpu.core_type<tc>} {
    %c0 = arith.constant 0 : index
    %c0_0 = arith.constant 0 : index
    %0 = vector.load %arg2[%c0, %c0_0] : memref<1x384xf32, #tpu.memory_space<vmem>>, vector<1x384xf32>
    %1 = vector.extract_strided_slice %0 {offsets = [0, 0], sizes = [1, 96], strides = [1, 1]} : vector<1x384xf32> to vector<1x96xf32>
    %2 = vector.extract_strided_slice %0 {offsets = [0, 128], sizes = [1, 96], strides = [1, 1]} : vector<1x384xf32> to vector<1x96xf32>
    %3 = vector.extract_strided_slice %0 {offsets = [0, 256], sizes = [1, 64], strides = [1, 1]} : vector<1x384xf32> to vector<1x64xf32>
    %4 = vector.extract_strided_slice %0 {offsets = [0, 320], sizes = [1, 3], strides = [1, 1]} : vector<1x384xf32> to vector<1x3xf32>
    %c0_1 = arith.constant 0 : index
    %c0_2 = arith.constant 0 : index
    %5 = vector.load %arg0[%c0_1, %c0_2] : memref<1x17xf32, #tpu.memory_space<vmem>>, vector<1x17xf32>
    %c0_3 = arith.constant 0 : index
    %c0_4 = arith.constant 0 : index
    %6 = vector.load %arg3[%c0_3, %c0_4] : memref<64x384xf32, #tpu.memory_space<vmem>>, vector<17x96xf32>
    %cst = arith.constant dense<0.000000e+00> : vector<1x96xf32>
    %7 = tpu.matmul %5, %6, %cst {dimension_numbers = #tpu.dot_dimension_numbers<[1], [0], [0], [1], [0, 0, 1, 1], [], []>} : vector<1x17xf32>, vector<17x96xf32>, vector<1x96xf32> -> vector<1x96xf32>
    %8 = arith.addf %7, %1 : vector<1x96xf32>
    %9 = vector.extract_strided_slice %8 {offsets = [0, 0], sizes = [1, 32], strides = [1, 1]} : vector<1x96xf32> to vector<1x32xf32>
    %10 = vector.extract_strided_slice %8 {offsets = [0, 32], sizes = [1, 32], strides = [1, 1]} : vector<1x96xf32> to vector<1x32xf32>
    %11 = vector.extract_strided_slice %8 {offsets = [0, 64], sizes = [1, 32], strides = [1, 1]} : vector<1x96xf32> to vector<1x32xf32>
    %12 = vector.extract_strided_slice %2 {offsets = [0, 0], sizes = [1, 32], strides = [1, 1]} : vector<1x96xf32> to vector<1x32xf32>
    %13 = vector.extract_strided_slice %2 {offsets = [0, 32], sizes = [1, 32], strides = [1, 1]} : vector<1x96xf32> to vector<1x32xf32>
    %14 = vector.extract_strided_slice %2 {offsets = [0, 64], sizes = [1, 32], strides = [1, 1]} : vector<1x96xf32> to vector<1x32xf32>
    %15 = arith.addf %9, %12 : vector<1x32xf32>
    %16 = arith.negf %15 : vector<1x32xf32>
    %17 = math.exp %16 : vector<1x32xf32>
    %cst_5 = arith.constant 1.000000e+00 : f32
    %18 = vector.broadcast %cst_5 : f32 to vector<1x32xf32>
    %19 = arith.addf %18, %17 : vector<1x32xf32>
    %20 = arith.divf %18, %19 : vector<1x32xf32>
    %21 = arith.addf %10, %13 : vector<1x32xf32>
    %22 = arith.negf %21 : vector<1x32xf32>
    %23 = math.exp %22 : vector<1x32xf32>
    %cst_6 = arith.constant 1.000000e+00 : f32
    %24 = vector.broadcast %cst_6 : f32 to vector<1x32xf32>
    %25 = arith.addf %24, %23 : vector<1x32xf32>
    %26 = arith.divf %24, %25 : vector<1x32xf32>
    %27 = arith.mulf %20, %14 : vector<1x32xf32>
    %28 = arith.addf %11, %27 : vector<1x32xf32>
    %29 = math.tanh %28 : vector<1x32xf32>
    %cst_7 = arith.constant 1.000000e+00 : f32
    %30 = vector.broadcast %cst_7 : f32 to vector<1x32xf32>
    %31 = arith.subf %30, %26 : vector<1x32xf32>
    %32 = arith.mulf %31, %29 : vector<1x32xf32>
    %33 = vector.extract_strided_slice %32 {offsets = [0, 0], sizes = [1, 16], strides = [1, 1]} : vector<1x32xf32> to vector<1x16xf32>
    %34 = vector.extract_strided_slice %32 {offsets = [0, 16], sizes = [1, 16], strides = [1, 1]} : vector<1x32xf32> to vector<1x16xf32>
    %35 = tpu.iota {dimensions = array<i32: 0>} : vector<16x256xi32>
    %36 = tpu.iota {dimensions = array<i32: 1>} : vector<16x256xi32>
    %c15_i32 = arith.constant 15 : i32
    %37 = vector.broadcast %c15_i32 : i32 to vector<16x256xi32>
    %38 = arith.andi %36, %37 : vector<16x256xi32>
    %39 = arith.cmpi eq, %38, %35 : vector<16x256xi32>
    %40 = arith.extui %39 : vector<16x256xi1> to vector<16x256xi32>
    %41 = arith.sitofp %40 : vector<16x256xi32> to vector<16x256xf32>
    %c4_i32 = arith.constant 4 : i32
    %42 = vector.broadcast %c4_i32 : i32 to vector<16x256xi32>
    %43 = arith.shrsi %36, %42 : vector<16x256xi32>
    %44 = arith.cmpi eq, %43, %35 : vector<16x256xi32>
    %45 = arith.extui %44 : vector<16x256xi1> to vector<16x256xi32>
    %46 = arith.sitofp %45 : vector<16x256xi32> to vector<16x256xf32>
    %cst_8 = arith.constant dense<0.000000e+00> : vector<1x256xf32>
    %47 = tpu.matmul %33, %41, %cst_8 {dimension_numbers = #tpu.dot_dimension_numbers<[1], [0], [0], [1], [0, 0, 1, 1], [], []>} : vector<1x16xf32>, vector<16x256xf32>, vector<1x256xf32> -> vector<1x256xf32>
    %48 = vector.shape_cast %47 : vector<1x256xf32> to vector<1x256xf32>
    %49 = vector.broadcast %48 : vector<1x256xf32> to vector<16x256xf32>
    %50 = arith.mulf %49, %46 : vector<16x256xf32>
    %51 = arith.truncf %50 : vector<16x256xf32> to vector<16x256xbf16>
    %c0_9 = arith.constant 0 : index
    %c0_10 = arith.constant 0 : index
    %52 = vector.load %arg4[%c0_9, %c0_10] : memref<256x256xbf16, #tpu.memory_space<vmem>>, vector<256x256xbf16>
    %cst_11 = arith.constant dense<0.000000e+00> : vector<16x256xf32>
    %53 = tpu.matmul %51, %52, %cst_11 {dimension_numbers = #tpu.dot_dimension_numbers<[1], [0], [0], [1], [0, 0, 1, 1], [], []>} : vector<16x256xbf16>, vector<256x256xbf16>, vector<16x256xf32> -> vector<16x256xf32>
    %c0_12 = arith.constant 0 : index
    %c0_13 = arith.constant 0 : index
    %54 = vector.load %arg5[%c0_12, %c0_13] : memref<16x256xf32, #tpu.memory_space<vmem>>, vector<16x256xf32>
    %55 = arith.addf %53, %54 : vector<16x256xf32>
    %56 = tpu.iota {dimensions = array<i32: 1>} : vector<16x256xi32>
    %c0_14 = arith.constant 0 : index
    %c0_15 = arith.constant 0 : index
    %57 = vector.load %arg1[%c0_14, %c0_15] : memref<16x256xf32, #tpu.memory_space<vmem>>, vector<16x256xf32>
    %58 = arith.addf %55, %57 : vector<16x256xf32>
    %cst_16 = arith.constant dense<0xFF800000> : vector<16xf32>
    %59 = vector.multi_reduction <maximumf>, %58, %cst_16 [1] : vector<16x256xf32> to vector<16xf32>
    %60 = vector.shape_cast %59 : vector<16xf32> to vector<16x1xf32>
    %61 = vector.broadcast %60 : vector<16x1xf32> to vector<16x256xf32>
    %62 = arith.cmpf oge, %58, %61 : vector<16x256xf32>
    %c256_i32 = arith.constant 256 : i32
    %63 = vector.broadcast %c256_i32 : i32 to vector<16x256xi32>
    %64 = arith.select %62, %56, %63 : vector<16x256xi1>, vector<16x256xi32>
    %cst_17 = arith.constant dense<2147483647> : vector<16xi32>
    %65 = vector.multi_reduction <minsi>, %64, %cst_17 [1] : vector<16x256xi32> to vector<16xi32>
    %66 = vector.shape_cast %65 : vector<16xi32> to vector<16x1xi32>
    %cst_18 = arith.constant dense<0xFF800000> : vector<16xf32>
    %67 = vector.multi_reduction <maximumf>, %55, %cst_18 [1] : vector<16x256xf32> to vector<16xf32>
    %68 = vector.shape_cast %67 : vector<16xf32> to vector<16x1xf32>
    %69 = vector.broadcast %68 : vector<16x1xf32> to vector<16x256xf32>
    %70 = arith.subf %55, %69 : vector<16x256xf32>
    %71 = math.exp %70 : vector<16x256xf32>
    %cst_19 = arith.constant dense<0.000000e+00> : vector<16xf32>
    %72 = vector.multi_reduction <add>, %71, %cst_19 [1] : vector<16x256xf32> to vector<16xf32>
    %73 = vector.shape_cast %72 : vector<16xf32> to vector<16x1xf32>
    %74 = math.log %73 : vector<16x1xf32>
    %75 = arith.addf %68, %74 : vector<16x1xf32>
    %76 = vector.broadcast %66 : vector<16x1xi32> to vector<16x256xi32>
    %77 = arith.cmpi eq, %56, %76 : vector<16x256xi32>
    %cst_20 = arith.constant 0.000000e+00 : f32
    %78 = vector.broadcast %cst_20 : f32 to vector<16x256xf32>
    %79 = arith.select %77, %55, %78 : vector<16x256xi1>, vector<16x256xf32>
    %cst_21 = arith.constant dense<0.000000e+00> : vector<16xf32>
    %80 = vector.multi_reduction <add>, %79, %cst_21 [1] : vector<16x256xf32> to vector<16xf32>
    %81 = vector.shape_cast %80 : vector<16xf32> to vector<16x1xf32>
    %82 = arith.subf %81, %75 : vector<16x1xf32>
    %83 = tpu.iota {dimensions = array<i32: 0>} : vector<16x32xi32>
    %84 = tpu.iota {dimensions = array<i32: 1>} : vector<16x32xi32>
    %85 = arith.cmpi eq, %84, %83 : vector<16x32xi32>
    %86 = arith.sitofp %66 : vector<16x1xi32> to vector<16x1xf32>
    %cst_22 = arith.constant 0.000000e+00 : f32
    %87 = vector.shape_cast %86 : vector<16x1xf32> to vector<16x1xf32>
    %88 = vector.broadcast %87 : vector<16x1xf32> to vector<16x32xf32>
    %89 = vector.broadcast %cst_22 : f32 to vector<16x32xf32>
    %90 = arith.select %85, %88, %89 : vector<16x32xi1>, vector<16x32xf32>
    %c16_i32 = arith.constant 16 : i32
    %91 = vector.broadcast %c16_i32 : i32 to vector<16x32xi32>
    %92 = arith.addi %83, %91 : vector<16x32xi32>
    %93 = arith.cmpi eq, %84, %92 : vector<16x32xi32>
    %cst_23 = arith.constant 0.000000e+00 : f32
    %94 = vector.shape_cast %82 : vector<16x1xf32> to vector<16x1xf32>
    %95 = vector.broadcast %94 : vector<16x1xf32> to vector<16x32xf32>
    %96 = vector.broadcast %cst_23 : f32 to vector<16x32xf32>
    %97 = arith.select %93, %95, %96 : vector<16x32xi1>, vector<16x32xf32>
    %98 = arith.addf %90, %97 : vector<16x32xf32>
    %cst_24 = arith.constant dense<0.000000e+00> : vector<32xf32>
    %99 = vector.multi_reduction <add>, %98, %cst_24 [0] : vector<16x32xf32> to vector<32xf32>
    %100 = vector.shape_cast %99 : vector<32xf32> to vector<1x32xf32>
    %101 = vector.extract_strided_slice %100 {offsets = [0, 0], sizes = [1, 16], strides = [1, 1]} : vector<1x32xf32> to vector<1x16xf32>
    %c0_25 = arith.constant 0 : index
    %c128 = arith.constant 128 : index
    %102 = vector.load %arg3[%c0_25, %c128] : memref<64x384xf32, #tpu.memory_space<vmem>>, vector<32x64xf32>
    %c0_26 = arith.constant 0 : index
    %c256 = arith.constant 256 : index
    %103 = vector.load %arg3[%c0_26, %c256] : memref<64x384xf32, #tpu.memory_space<vmem>>, vector<64x3xf32>
    %104 = vector.extract_strided_slice %102 {offsets = [0, 0], sizes = [16, 64], strides = [1, 1]} : vector<32x64xf32> to vector<16x64xf32>
    %cst_27 = arith.constant dense<0.000000e+00> : vector<1x64xf32>
    %105 = tpu.matmul %34, %104, %cst_27 {dimension_numbers = #tpu.dot_dimension_numbers<[1], [0], [0], [1], [0, 0, 1, 1], [], []>} : vector<1x16xf32>, vector<16x64xf32>, vector<1x64xf32> -> vector<1x64xf32>
    %106 = vector.extract_strided_slice %102 {offsets = [16, 0], sizes = [16, 64], strides = [1, 1]} : vector<32x64xf32> to vector<16x64xf32>
    %cst_28 = arith.constant dense<0.000000e+00> : vector<1x64xf32>
    %107 = tpu.matmul %101, %106, %cst_28 {dimension_numbers = #tpu.dot_dimension_numbers<[1], [0], [0], [1], [0, 0, 1, 1], [], []>} : vector<1x16xf32>, vector<16x64xf32>, vector<1x64xf32> -> vector<1x64xf32>
    %108 = arith.addf %105, %107 : vector<1x64xf32>
    %109 = arith.addf %108, %3 : vector<1x64xf32>
    %cst_29 = arith.constant 0.000000e+00 : f32
    %110 = vector.broadcast %cst_29 : f32 to vector<1x64xf32>
    %111 = arith.maximumf %109, %110 : vector<1x64xf32>
    %cst_30 = arith.constant dense<0.000000e+00> : vector<1x3xf32>
    %112 = tpu.matmul %111, %103, %cst_30 {dimension_numbers = #tpu.dot_dimension_numbers<[1], [0], [0], [1], [0, 0, 1, 1], [], []>} : vector<1x64xf32>, vector<64x3xf32>, vector<1x3xf32> -> vector<1x3xf32>
    %113 = arith.addf %112, %4 : vector<1x3xf32>
    %cst_31 = arith.constant 0.000000e+00 : f32
    %114 = vector.broadcast %cst_31 : f32 to vector<1x224xf32>
    %115 = tpu.concatenate %100, %114 in 1 : vector<1x32xf32>, vector<1x224xf32> -> vector<1x256xf32>
    %cst_32 = arith.constant 0.000000e+00 : f32
    %116 = vector.broadcast %cst_32 : f32 to vector<1x253xf32>
    %117 = tpu.concatenate %113, %116 in 1 : vector<1x3xf32>, vector<1x253xf32> -> vector<1x256xf32>
    %cst_33 = arith.constant 0.000000e+00 : f32
    %118 = vector.broadcast %cst_33 : f32 to vector<6x256xf32>
    %119 = tpu.concatenate %115, %117, %118 in 0 : vector<1x256xf32>, vector<1x256xf32>, vector<6x256xf32> -> vector<8x256xf32>
    %c0_34 = arith.constant 0 : index
    %c0_35 = arith.constant 0 : index
    %120 = vector.load %arg6[%c0_34, %c0_35] : memref<24x256xf32, #tpu.memory_space<vmem>>, vector<16x256xf32>
    tpu.vector_store %arg6[%c0_34, %c0_35], %55 {strides = array<i32>} : memref<24x256xf32, #tpu.memory_space<vmem>>, vector<16x256xf32>,
    %c16 = arith.constant 16 : index
    %c0_36 = arith.constant 0 : index
    %121 = vector.load %arg6[%c16, %c0_36] : memref<24x256xf32, #tpu.memory_space<vmem>>, vector<8x256xf32>
    tpu.vector_store %arg6[%c16, %c0_36], %119 {strides = array<i32>} : memref<24x256xf32, #tpu.memory_space<vmem>>, vector<8x256xf32>,
    return
  }
}

</mosaic_0001>

<bundles_post_ra>
// kernel: tpu_custom_call.1
= control target key start
LH: loop header
LB: loop body
LE: loop exit
PB: predicated region body
PF: predicated region fallthrough
CT: control target
= control target key end

     0   :  { %11 = vsyncpa [#allocation3], 0  ;;  %s1598_s0 = inlined_call_operand.hbm [shape: f32[1,17], index: 0, kind: input, shape index: {}]   ;;  %s1599_s1 = inlined_call_operand.hbm [shape: f32[16,256], index: 1, kind: input, shape index: {}]   ;;  %s1600_s2 = inlined_call_operand.vmem [shape: f32[1,384], index: 2, kind: input, shape index: {}]   ;;  %s1601_s3 = inlined_call_operand.hbm [shape: f32[64,384], index: 3, kind: input, shape index: {}]   ;;  %s1602_s4 = inlined_call_operand.hbm [shape: bf16[256,256], index: 4, kind: input, shape index: {}]   ;;  %s1603_s5 = inlined_call_operand.hbm [shape: f32[16,256], index: 5, kind: input, shape index: {}]   ;;  %s1604_s6 = inlined_call_operand.hbm [shape: f32[24,256], index: 6, kind: output, shape index: {}]  }
   0x1   :  { %12 = vsyncpa [#allocation6], 0 }
   0x2   :  { %13 = vsyncpa [#allocation9], 0 }
   0x3   :  { %14 = vsyncpa [#allocation4], 0  ;;  %s1334_s21 = smov [#allocation5]   ;;  %s1194_s25 = scalar_lea.hbm %s1599_s1, 512 }
   0x4   :  { %s30_s22 = sshll.u32 %s1334_s21, 4  ;;  %p1195_p0 = scmp.ne.s32.totalorder %s1599_s1, %s1194_s25  ;;  %s31_s22 = int_to_ptr.vmem [resolvable:$true] %s30_s22 }
   0x5   :  { %p1198_p1 = scmp.lt.u32.totalorder %s1194_s25, %s1599_s1 }
   0x7   :  { %p1200_p2 = pnand %p1198_p1, %p1195_p0 }
   0x9   :  { %1203 = shalt.err (!%p1200_p2)
}
   0xa   :  { %s1204_s30 = scalar_lea.vmem %s31_s22, 512  ;;  %p1209_p4 = scmp.lt.s32.totalorder %s31_s22, %s31_s22 }
   0xb   :  { %p1205_p3 = scmp.ne.s32.totalorder %s31_s22, %s1204_s30  ;;  %p1210_p5 = scmp.lt.s32.totalorder %s1204_s30, %s1204_s30 }
   0xd   :  { %p1211_p6 = por %p1210_p5, %p1209_p4 }
   0xf   :  { %p1212_p7 = pnand %p1211_p6, %p1205_p3 }
  0x11   :  { %1215 = shalt.err (!%p1212_p7)
}
  0x12   :  { %s1335_s7 = smov 256   ;;  %s1336_s8 = smov 16  }
  0x13   :  { %36 = dma.hbm_to_vmem [thread:$0]  %s1599_s1, 512, %s31_s22, [#allocation6], %s1335_s7, %s1335_s7, %s1336_s8  }
  0x14   :  { %s1337_s11 = smov [#allocation8]   ;;  %s1216_s15 = scalar_lea.hbm %s1602_s4, 4096 }
  0x15   :  { %s56_s12 = sshll.u32 %s1337_s11, 4  ;;  %p1217_p8 = scmp.ne.s32.totalorder %s1602_s4, %s1216_s15  ;;  %s57_s12 = int_to_ptr.vmem [resolvable:$true] %s56_s12 }
  0x16   :  { %p1220_p9 = scmp.lt.u32.totalorder %s1216_s15, %s1602_s4 }
  0x18   :  { %p1222_p10 = pnand %p1220_p9, %p1217_p8 }
  0x1a   :  { %1225 = shalt.err (!%p1222_p10)
}
  0x1b   :  { %s1226_s20 = scalar_lea.vmem %s57_s12, 4096  ;;  %p1231_p12 = scmp.lt.s32.totalorder %s57_s12, %s57_s12 }
  0x1c   :  { %p1227_p11 = scmp.ne.s32.totalorder %s57_s12, %s1226_s20  ;;  %p1232_p13 = scmp.lt.s32.totalorder %s1226_s20, %s1226_s20 }
  0x1e   :  { %p1233_p0 = por %p1232_p13, %p1231_p12 }
  0x20   :  { %p1234_p1 = pnand %p1233_p0, %p1227_p11 }
  0x22   :  { %1237 = shalt.err (!%p1234_p1)
}
  0x23   :  { %s1338_s1 = smov 128   ;;  %s1339_s21 = smov 8  }
  0x24   :  { %62 = dma.hbm_to_vmem [thread:$0]  %s1602_s4, 4096, %s57_s12, [#allocation9], %s1338_s1, %s1338_s1, %s1339_s21  }
  0x25   :  { %s1340_s24 = smov [#allocation2]   ;;  %s1341_s26 = smov [#allocation7]  }
  0x26   :  { %s21_s25 = sshll.u32 %s1340_s24, 4  ;;  %s44_s27 = sshll.u32 %s1341_s26, 4  ;;  %s22_s25 = int_to_ptr.vmem [resolvable:$true] %s21_s25  ;;  %s1415_s27 = int_to_ptr.vmem [resolvable:$true] %s44_s27 }
  0x27   :  { %s1238_s30 = scalar_lea.hbm %s1598_s0, 16 }
  0x28   :  { %p1239_p2 = scmp.ne.s32.totalorder %s1598_s0, %s1238_s30  ;;  %p1242_p3 = scmp.lt.u32.totalorder %s1238_s30, %s1598_s0 }
  0x2a   :  { %p1244_p4 = pnand %p1242_p3, %p1239_p2 }
  0x2c   :  { %1247 = shalt.err (!%p1244_p4)
}
  0x2d   :  { %s1248_s4 = scalar_lea.vmem %s22_s25, 16  ;;  %s1252_s12 = scalar_lea.vmem %s22_s25, 32 }
  0x2e   :  { %p1249_p5 = scmp.ne.s32.totalorder %s22_s25, %s1248_s4  ;;  %p1253_p6 = scmp.lt.s32.totalorder %s22_s25, %s22_s25 }
  0x2f   :  { %p1254_p7 = scmp.lt.s32.totalorder %s1252_s12, %s1248_s4 }
  0x31   :  { %p1255_p8 = por %p1254_p7, %p1253_p6 }
  0x33   :  { %p1256_p9 = pnand %p1255_p8, %p1249_p5 }
  0x35   :  { %1259 = shalt.err (!%p1256_p9)
}
  0x36   :  { %24 = dma.hbm_to_vmem [thread:$0]  %s1598_s0, 16, %s22_s25, [#allocation3]  }
  0x37   :  { %s1260_s18 = scalar_lea.hbm %s1601_s3, 3072 }
  0x38   :  { %p1261_p10 = scmp.ne.s32.totalorder %s1601_s3, %s1260_s18  ;;  %p1264_p11 = scmp.lt.u32.totalorder %s1260_s18, %s1601_s3 }
  0x3a   :  { %p1266_p12 = pnand %p1264_p11, %p1261_p10 }
  0x3c   :  { %1269 = shalt.err (!%p1266_p12)
}
  0x3d   :  { %s1270_s22 = scalar_lea.vmem %s1415_s27, 3072  ;;  %p1275_p0 = scmp.lt.s32.totalorder %s1415_s27, %s1415_s27 }
  0x3e   :  { %p1271_p13 = scmp.ne.s32.totalorder %s1415_s27, %s1270_s22  ;;  %p1276_p1 = scmp.lt.s32.totalorder %s1270_s22, %s1270_s22 }
  0x40   :  { %p1277_p2 = por %p1276_p1, %p1275_p0 }
  0x42   :  { %p1278_p3 = pnand %p1277_p2, %p1271_p13 }
  0x44   :  { %1281 = shalt.err (!%p1278_p3)
}
  0x45   :  { %s1342_s0 = smov 384   ;;  %s1343_s23 = smov 24  }
  0x46   :  { %50 = dma.hbm_to_vmem [thread:$0]  %s1601_s3, 3072, %s1415_s27, [#allocation6], %s1342_s0, %s1342_s0, %s1343_s23  }
  0x47   :  { %s1344_s26 = smov [#allocation10]   ;;  %s1282_s9 = scalar_lea.hbm %s1603_s5, 512 }
  0x48   :  { %s68_s28 = sshll.u32 %s1344_s26, 4  ;;  %p1283_p4 = scmp.ne.s32.totalorder %s1603_s5, %s1282_s9  ;;  %s69_s28 = int_to_ptr.vmem [resolvable:$true] %s68_s28 }
  0x49   :  { %p1286_p5 = scmp.lt.u32.totalorder %s1282_s9, %s1603_s5 }
  0x4b   :  { %p1288_p6 = pnand %p1286_p5, %p1283_p4 }
  0x4d   :  { %1291 = shalt.err (!%p1288_p6)
}
  0x4e   :  { %s1292_s12 = scalar_lea.vmem %s69_s28, 512  ;;  %p1297_p8 = scmp.lt.s32.totalorder %s69_s28, %s69_s28 }
  0x4f   :  { %p1293_p7 = scmp.ne.s32.totalorder %s69_s28, %s1292_s12  ;;  %p1298_p9 = scmp.lt.s32.totalorder %s1292_s12, %s1292_s12 }
  0x51   :  { %p1299_p10 = por %p1298_p9, %p1297_p8 }
  0x53   :  { %p1300_p11 = pnand %p1299_p10, %p1293_p7 }
  0x55   :  { %1303 = shalt.err (!%p1300_p11)
}
  0x56   :  { %74 = dma.hbm_to_vmem [thread:$0]  %s1603_s5, 512, %s69_s28, [#allocation9], %s1335_s7, %s1335_s7, %s1336_s8  }
  0x57   :  { %1326 = dma.done.wait [#allocation3], 16  }
  0x58   :  { %1327 = vsyncadd [#allocation3], 4294967280 }
  0x59   :  { %1328 = dma.done.wait [#allocation6], 3584  }
  0x5a   :  { %1329 = vsyncadd [#allocation6], 4294963712 }
  0x5b   :  { %1330 = dma.done.wait [#allocation9], 4608  }
  0x5c   :  { %1331 = vsyncadd [#allocation9], 4294962688  ;;  %v1345_v0 = vmov 0.0|0.0   ;;  %v1346_v1 = vmov 0.0   ;;  %vm944_vm0 = vcmask 1041408   ;;  %v174_v3 = vlaneseq  ;;  %v92_v8 = vld [vmem:[#allocation7] sm:$0xff] }
  0x5d   :  { %1084 = vmatprep.subr.bf16.mxu0 %v1345_v0  ;;  %v939_v2 = vrot.slane %v1346_v1, 7  ;;  %vm99_vm1 = vcmask 1040384   ;;  %vm1347_vm2 = vmmov 0   ;;  %v93_v9 = vld [vmem:[#allocation7 + $0x18] sm:$0xff]  ;;  %v94_v12 = vld [vmem:[#allocation7 + $0x30] sm:$0x1] }
  0x5e   :  { %1048 = vmatprep.mubr.msk.f32.mxu0 %vm1347_vm2, %v1346_v1  ;;  %v1466_v5 = vshrl.u32 %v174_v3, 7  ;;  %v1085_v10 = vpack.c.bf16 %v93_v9, %v92_v8  ;;  %v1473_v11 = vld [vmem:[%s1600_s2] sm:$0x7]  ;;  %v91_v14 = vld [vmem:[#allocation2] sm:$0x1]  ;;  %s1348_s15 = smov 64  }
  0x5f   :  { %v943_v4 = vsel %vm99_vm1, 0.0, %v939_v2  ;;  %vm95_vm3 = vcmask 138240   ;;  %v1482_v25 = vand.u32 127, %v174_v3  ;;  %v1349_v32 = vmov 1.0|1.0   ;;  %s1350_s2 = smov 96  }
  0x60   :  { %v946_v6 = vsel %vm944_vm0, %v943_v4, 0.0  ;;  %v176_v7 = vsub.s32 1, %v1466_v5  ;;  %1086 = vmatpush3.bf16.msra.mxu0 %v1085_v10  ;;  %v1485_v28 = vadd.s32 8, %v1466_v5  ;;  %v1128_v34 = vld [vmem:[#allocation8 + $0x4] ss:$8 sps:$4 sm:$0xff]   ;;  %vm239_vm10 = vcmask 130048  }
  0x61   :  { %952 = vst [vmem:[#allocation11 + $0x28] sm:$0xff] %v946_v6  ;;  %1046 = vmatprep.subr.mxu0 %v1346_v1  ;;  %v1488_v29 = vadd.s32 128, %v1482_v25  ;;  %v208_v30 = vand.u32 15, %v1482_v25  ;;  %v1130_v35 = vld [vmem:[#allocation8] ss:$8 sps:$4 sm:$0xff]   ;;  %523 = vmatprep.subr.bf16.mxu1 %v1128_v34  ;;  %v222_v9 = vshra.s32 %v1482_v25, 4 }
  0x62   :  { %v177_v13 = vrot.slane %v1473_v11, %v176_v7  ;;  %v1131_v36 = vld [vmem:[#allocation8 + $0x14] ss:$8 sps:$4 sm:$0xff]   ;;  %524 = vmatpush1.bf16.msra.mxu1 %v1130_v35  ;;  %v1133_v37 = vld [vmem:[#allocation8 + $0x10] ss:$8 sps:$4 sm:$0xff]   ;;  %v1134_v38 = vld [vmem:[#allocation8 + $0x24] ss:$8 sps:$4 sm:$0xff]  }
  0x63   :  { %v209_v31 = vand.u32 15, %v1488_v29  ;;  %vm210_vm4 = vcmp.eq.s32.totalorder %v208_v30, %v1466_v5  ;;  %vm212_vm5 = vcmp.eq.s32.totalorder %v208_v30, %v1485_v28  ;;  %525 = vmatprep.subr.bf16.mxu1 %v1131_v36  ;;  %v1136_v39 = vld [vmem:[#allocation8 + $0x20] ss:$8 sps:$4 sm:$0xff]   ;;  %v1137_v40 = vld [vmem:[#allocation8 + $0x34] ss:$8 sps:$4 sm:$0xff]   ;;  %v223_v10 = vshra.s32 %v1488_v29, 4 }
  0x64   :  { %186 = vrot.lane.b32.xlu0 %v177_v13, %s1348_s15  ;;  %1047 = vmatpush3.msk.msra.mxu0 %vm99_vm1, %v94_v12  ;;  %vm1089_vm8 = vmpackc.low %vm212_vm5, %vm210_vm4  ;;  %v1139_v44 = vld [vmem:[#allocation8 + $0x30] ss:$8 sps:$4 sm:$0xff]   ;;  %v1140_v45 = vld [vmem:[#allocation8 + $0x44] ss:$8 sps:$4 sm:$0xff]   ;;  %vm224_vm11 = vcmp.eq.s32.totalorder %v222_v9, %v1466_v5  ;;  %vm226_vm12 = vcmp.eq.s32.totalorder %v222_v9, %v1485_v28  ;;  %v315_v12 = vsub.s32 0, %v1466_v5  ;;  %s1351_s16 = smov 80  }
  0x65   :  { %1049 = vmatmul.mubr.msk.f32.vlgmr.msra.gmra.mrb[0].mxu0 %vm95_vm3, %v91_v14  ;;  %vm211_vm6 = vcmp.eq.s32.totalorder %v209_v31, %v1466_v5  ;;  %vm213_vm7 = vcmp.eq.s32.totalorder %v209_v31, %v1485_v28  ;;  %v1142_v46 = vld [vmem:[#allocation8 + $0x40] ss:$8 sps:$4 sm:$0xff]   ;;  %v1143_v47 = vld [vmem:[#allocation8 + $0x54] ss:$8 sps:$4 sm:$0xff]   ;;  %v1145_v48 = vld [vmem:[#allocation8 + $0x50] ss:$8 sps:$4 sm:$0xff]   ;;  %vm225_vm13 = vcmp.eq.s32.totalorder %v223_v10, %v1466_v5  ;;  %vm227_vm14 = vcmp.eq.s32.totalorder %v223_v10, %v1485_v28 }
  0x66   :  { %306 = vmatprep.mubr.f32.mxu0 %v1346_v1  ;;  %vm1087_vm9 = vmpackc.low %vm213_vm7, %vm211_vm6  ;;  %526 = vmatpush1.bf16.msra.mxu1 %v1133_v37  ;;  %v1146_v49 = vld [vmem:[#allocation8 + $0x64] ss:$8 sps:$4 sm:$0xff]   ;;  %v1148_v50 = vld [vmem:[#allocation8 + $0x60] ss:$8 sps:$4 sm:$0xff]   ;;  %v981_v14 = vsel %vm226_vm12, 1.0, %v1346_v1  ;;  %s1352_s17 = smov [#allocation11]  }
  0x67   :  { %1088 = vmatprep.subr.msk.bf16.mxu0 %vm1087_vm9, %v1349_v32  ;;  %527 = vmatprep.subr.bf16.mxu1 %v1134_v38  ;;  %v1149_v51 = vld [vmem:[#allocation8 + $0x74] ss:$8 sps:$4 sm:$0xff]   ;;  %v1151_v52 = vld [vmem:[#allocation8 + $0x70] ss:$8 sps:$4 sm:$0xff]   ;;  %v1152_v53 = vld [vmem:[#allocation8 + $0x84] ss:$8 sps:$4 sm:$0xff]  }
  0x68   :  { %1090 = vmatpush1.bf16.msk.msra.mxu0 %vm1089_vm8, %v1349_v32  ;;  %v1154_v54 = vld [vmem:[#allocation8 + $0x80] ss:$8 sps:$4 sm:$0xff]   ;;  %v1155_v55 = vld [vmem:[#allocation8 + $0x94] ss:$8 sps:$4 sm:$0xff]   ;;  %v1157_v56 = vld [vmem:[#allocation8 + $0x90] ss:$8 sps:$4 sm:$0xff]  }
  0x69   :  { %1091 = vmatprep.subr.bf16.mxu0 %v1345_v0  ;;  %v1158_v57 = vld [vmem:[#allocation8 + $0xa4] ss:$8 sps:$4 sm:$0xff]   ;;  %v1160_v58 = vld [vmem:[#allocation8 + $0xa0] ss:$8 sps:$4 sm:$0xff]   ;;  %v1161_v59 = vld [vmem:[#allocation8 + $0xb4] ss:$8 sps:$4 sm:$0xff]  }
  0x6a   :  { %528 = vmatpush1.bf16.msra.mxu1 %v1136_v39  ;;  %v1163_v60 = vld [vmem:[#allocation8 + $0xb0] ss:$8 sps:$4 sm:$0xff]   ;;  %v1164_v61 = vld [vmem:[#allocation8 + $0xc4] ss:$8 sps:$4 sm:$0xff]   ;;  %v1166_v62 = vld [vmem:[#allocation8 + $0xc0] ss:$8 sps:$4 sm:$0xff]  }
  0x6b   :  { %529 = vmatprep.subr.bf16.mxu1 %v1137_v40  ;;  %v1167_v63 = vld [vmem:[#allocation8 + $0xd4] ss:$8 sps:$4 sm:$0xff]   ;;  %v1169_v2 = vld [vmem:[#allocation8 + $0xd0] ss:$8 sps:$4 sm:$0xff]   ;;  %v1170_v4 = vld [vmem:[#allocation8 + $0xe4] ss:$8 sps:$4 sm:$0xff]  }
  0x6c   :  { %v1172_v6 = vld [vmem:[#allocation8 + $0xe0] ss:$8 sps:$4 sm:$0xff]   ;;  %v1173_v7 = vld [vmem:[#allocation8 + $0xf4] ss:$8 sps:$4 sm:$0xff]   ;;  %v1175_v8 = vld [vmem:[#allocation8 + $0xf0] ss:$8 sps:$4 sm:$0xff]  }
  0x6d   :  { %v359_v30 = vld [vmem:[#allocation10] sm:$0xff]  ;;  %v360_v31 = vld [vmem:[#allocation10 + $0x8] sm:$0xff]  ;;  %v362_v37 = vld [vmem:[#allocation10 + $0x18] sm:$0xff]  ;;  %s958_s18 = sshll.u32 %s1352_s17, 4  ;;  %s959_s18 = int_to_ptr.vmem [resolvable:$true] %s958_s18 }
  0x6e   :  { %530 = vmatpush1.bf16.msra.mxu1 %v1139_v44  ;;  %v566_v34 = vld [vmem:[#allocation5] sm:$0xff]  ;;  %v567_v38 = vld [vmem:[#allocation5 + $0x8] sm:$0xff]  ;;  %s1304_s19 = scalar_lea.vmem %s959_s18, 768  ;;  %p1309_p13 = scmp.lt.s32.totalorder %s959_s18, %s959_s18 }
  0x6f   :  { %531 = vmatprep.subr.bf16.mxu1 %v1140_v45  ;;  %p1305_p12 = scmp.ne.s32.totalorder %s959_s18, %s1304_s19  ;;  %p1310_p0 = scmp.lt.s32.totalorder %s1304_s19, %s1304_s19 }
  0x71   :  { %p1311_p1 = por %p1310_p0, %p1309_p13 }
  0x72   :  { %532 = vmatpush1.bf16.msra.mxu1 %v1142_v46  ;;  %v569_v46 = vld [vmem:[#allocation5 + $0x18] sm:$0xff] }
  0x73   :  { %533 = vmatprep.subr.bf16.mxu1 %v1143_v47  ;;  %p1312_p2 = pnand %p1311_p1, %p1305_p12 }
  0x76   :  { %534 = vmatpush1.bf16.msra.mxu1 %v1145_v48 }
  0x77   :  { %535 = vmatprep.subr.bf16.mxu1 %v1146_v49 }
  0x7a   :  { %536 = vmatpush1.bf16.msra.mxu1 %v1148_v50 }
  0x7b   :  { %537 = vmatprep.subr.bf16.mxu1 %v1149_v51 }
  0x7e   :  { %538 = vmatpush1.bf16.msra.mxu1 %v1151_v52 }
  0x7f   :  { %539 = vmatprep.subr.bf16.mxu1 %v1152_v53 }
  0x82   :  { %540 = vmatpush1.bf16.msra.mxu1 %v1154_v54 }
  0x83   :  { %541 = vmatprep.subr.bf16.mxu1 %v1155_v55 }
  0x86   :  { %542 = vmatpush1.bf16.msra.mxu1 %v1157_v56 }
  0x87   :  { %543 = vmatprep.subr.bf16.mxu1 %v1158_v57 }
  0x8a   :  { %544 = vmatpush1.bf16.msra.mxu1 %v1160_v58 }
  0x8b   :  { %545 = vmatprep.subr.bf16.mxu1 %v1161_v59 }
  0x8e   :  { %546 = vmatpush1.bf16.msra.mxu1 %v1163_v60 }
  0x8f   :  { %547 = vmatprep.subr.bf16.mxu1 %v1164_v61 }
  0x92   :  { %548 = vmatpush1.bf16.msra.mxu1 %v1166_v62 }
  0x93   :  { %549 = vmatprep.subr.bf16.mxu1 %v1167_v63 }
  0x96   :  { %550 = vmatpush1.bf16.msra.mxu1 %v1169_v2 }
  0x97   :  { %551 = vmatprep.subr.bf16.mxu1 %v1170_v4 }
  0x9a   :  { %552 = vmatpush1.bf16.msra.mxu1 %v1172_v6 }
  0x9b   :  { %553 = vmatprep.subr.bf16.mxu1 %v1173_v7 }
  0x9e   :  { %554 = vmatpush1.bf16.msra.mxu1 %v1175_v8 }
  0xd6   :  { %v187_v22 = vpop.permute.xlu0 %186 }
 0x138   :  { %v169_v15 = vpop.f32.mrb[0].mxu0 }
 0x139   :  { %v170_v16 = vadd.f32 %v169_v15, %v1473_v11  ;;  %v1050_v17 = vpop.f32.mrb[1].mxu0 }
 0x13b   :  { %v179_v18 = vadd.f32 %v177_v13, %v170_v16  ;;  %v979_v13 = vsel %vm224_vm11, 1.0, %v1346_v1 }
 0x13d   :  { %v974_v19 = vmul.f32 -1.442695, %v179_v18  ;;  %v980_v18 = vsel %vm225_vm13, 1.0, %v1346_v1 }
 0x13f   :  { %1176 = vpow2.f32 %v974_v19  ;;  %v982_v19 = vsel %vm227_vm14, 1.0, %v1346_v1 }
 0x149   :  { %v1177_v20 = vpop.eup %1176 }
 0x14a   :  { %v183_v21 = vadd.f32 1.0, %v1177_v20 }
 0x14c   :  { %1178 = vrcp.f32 %v183_v21 }
 0x156   :  { %v1179_v23 = vpop.eup %1178 }
 0x157   :  { %v189_v24 = vmul.f32 %v1179_v23, %v187_v22  ;;  %v196_v41 = vsub.f32 1.0, %v1179_v23 }
 0x159   :  { %191 = vrot.lane.b32.xlu0 %v189_v24, %s1348_s15 }
 0x1cb   :  { %v192_v26 = vpop.permute.xlu0 %191 }
 0x1cc   :  { %v194_v27 = vadd.f32 %v192_v26, %v170_v16 }
 0x1ce   :  { %1180 = vtanh.f32 %v194_v27 }
 0x1d8   :  { %v1181_v33 = vpop.eup %1180 }
 0x1d9   :  { %198 = vrot.lane.b32.xlu1 %v1181_v33, %s1350_s2  ;;  %v361_v33 = vld [vmem:[#allocation10 + $0x10] sm:$0xff] }
 0x24b   :  { %v199_v42 = vpop.permute.xlu1 %198 }
 0x24c   :  { %v1497_v43 = vmul.f32 %v199_v42, %v196_v41  ;;  %v568_v41 = vld [vmem:[#allocation5 + $0x10] sm:$0xff] }
 0x24e   :  { %237 = vrot.lane.b32.xlu1 %v1497_v43, %s1350_s2 }
 0x2c0   :  { %v238_v3 = vpop.permute.xlu1 %237 }
 0x2c1   :  { %987 = vmatmul.mubr.msk.f32.vlgmr.msra.gmra.mrb[2].mxu0 %vm239_vm10, %v238_v3 }
 0x2c2   :  { %1055 = vmatprep.mubr.msk.f32.mxu0 %vm1347_vm2, %v1346_v1 }
 0x394   :  { %v308_v15 = vpop.f32.mrb[2].mxu0 }
 0x395   :  { %v316_v16 = vrot.slane %v308_v15, %v315_v12  ;;  %v310_v17 = vpop.f32.mrb[3].mxu0 }
 0x396   :  { %v320_v20 = vrot.slane %v310_v17, %v315_v12 }
 0x397   :  { %v321_v21 = vmul.f32 %v979_v13, %v316_v16  ;;  %v323_v22 = vmul.f32 %v981_v14, %v316_v16 }
 0x398   :  { %v322_v23 = vmul.f32 %v980_v18, %v320_v20  ;;  %v324_v24 = vmul.f32 %v982_v19, %v320_v20 }
 0x399   :  { %v325_v27 = vpack.c.bf16 %v323_v22, %v321_v21 }
 0x39a   :  { %v326_v26 = vpack.c.bf16 %v324_v24, %v322_v23 }
 0x39c   :  { %555 = vmatprep.mubr.bf16.mxu1 %v326_v26 }
 0x39d   :  { %556 = vmatmul.mubr.bf16.vlgmr.msra.gmra.mrb[0].mxu1 %v325_v27 }
 0x470   :  { %v557_v32 = vpop.f32.mrb[0].mxu1 }
 0x471   :  { %v1514_v35 = vadd.f32 %v557_v32, %v359_v30  ;;  %v559_v36 = vpop.f32.mrb[1].mxu1 }
 0x472   :  { %v1516_v39 = vadd.f32 %v559_v36, %v360_v31  ;;  %v561_v40 = vpop.f32.mrb[2].mxu1 }
 0x473   :  { %947 = vst [vmem:[#allocation11] sm:$0xff] %v1514_v35  ;;  %v1519_v42 = vadd.f32 %v561_v40, %v361_v33  ;;  %v563_v44 = vpop.f32.mrb[3].mxu1  ;;  %v570_v45 = vadd.f32 %v566_v34, %v1514_v35 }
 0x474   :  { %948 = vst [vmem:[#allocation11 + $0x8] sm:$0xff] %v1516_v39  ;;  %v1523_v47 = vadd.f32 %v563_v44, %v362_v37  ;;  %v571_v48 = vadd.f32 %v567_v38, %v1516_v39  ;;  %v620_v53 = vmax.f32 %v1514_v35, %v1516_v39 }
 0x475   :  { %949 = vst [vmem:[#allocation11 + $0x10] sm:$0xff] %v1519_v42  ;;  %v572_v49 = vadd.f32 %v568_v41, %v1519_v42 }
 0x476   :  { %950 = vst [vmem:[#allocation11 + $0x18] sm:$0xff] %v1523_v47  ;;  %v574_v50 = vmax.f32 %v570_v45, %v571_v48  ;;  %v573_v51 = vadd.f32 %v569_v46, %v1523_v47  ;;  %v623_v4 = vmax.f32 %v1519_v42, %v1523_v47 }
 0x478   :  { %575 = vmax.xlane.f32.xlu0 %v574_v50  ;;  %v577_v52 = vmax.f32 %v572_v49, %v573_v51 }
 0x47a   :  { %578 = vmax.xlane.f32.xlu1 %v577_v52 }
 0x47e   :  { %621 = vmax.xlane.f32.xlu1 %v620_v53 }
 0x505   :  { %v576_v54 = vpop.xlane.xlu0 %575 }
 0x506   :  { %vm580_vm15 = vcmp.ge.f32.partialorder %v570_v45, %v576_v54  ;;  %vm581_vm3 = vcmp.ge.f32.partialorder %v571_v48, %v576_v54 }
 0x507   :  { %v584_v55 = vsel %vm580_vm15, %v1482_v25, 256  ;;  %v585_v56 = vsel %vm581_vm3, %v1488_v29, 256  ;;  %v579_v57 = vpop.xlane.xlu1 %578  ;;  %vm666_vm3 = vcmp.eq.s32.totalorder %v1482_v25, %v1466_v5 }
 0x508   :  { %vm588_vm4 = vcmp.lt.s32.totalorder %v584_v55, %v585_v56  ;;  %vm582_vm5 = vcmp.ge.f32.partialorder %v572_v49, %v579_v57  ;;  %vm583_vm6 = vcmp.ge.f32.partialorder %v573_v51, %v579_v57 }
 0x509   :  { %v586_v58 = vsel %vm582_vm5, %v1482_v25, 256  ;;  %v587_v59 = vsel %vm583_vm6, %v1488_v29, 256  ;;  %v589_v60 = vsel %vm588_vm4, %v584_v55, %v585_v56  ;;  %v692_v55 = vld [vmem:[#allocation7 + $0x38] sm:$0xff]  ;;  %vm667_vm4 = vcmp.eq.s32.totalorder %v1482_v25, %v1485_v28 }
 0x50a   :  { %vm604_vm7 = vcmp.lt.s32.totalorder %v586_v58, %v587_v59  ;;  %v591_v61 = vshra.s32 %v589_v60, 16  ;;  %v590_v12 = vand.u32 65535, %v589_v60  ;;  %vm680_vm6 = vcmask 261120  }
 0x50b   :  { %v605_v62 = vsel %vm604_vm7, %v586_v58, %v587_v59  ;;  %v1538_v6 = vpop.xlane.xlu1 %621 }
 0x50c   :  { %v593_v63 = vcvt.s32.f32 %v591_v61  ;;  %v607_v2 = vshra.s32 %v605_v62, 16  ;;  %v626_v7 = vsub.f32 %v1514_v35, %v1538_v6  ;;  %v627_v8 = vsub.f32 %v1516_v39, %v1538_v6 }
 0x50d   :  { %v592_v14 = vcvt.s32.f32 %v590_v12  ;;  %v606_v15 = vand.u32 65535, %v605_v62  ;;  %v673_v61 = vadd.s32 16, %v1485_v28  ;;  %v690_v28 = vld [vmem:[#allocation7 + $0x8] sm:$0xff] }
 0x50e   :  { %594 = vmin.xlane.f32.xlu0 %v593_v63  ;;  %v609_v3 = vcvt.s32.f32 %v607_v2  ;;  %v630_v9 = vmul.f32 1.442695, %v626_v7  ;;  %v632_v10 = vmul.f32 1.442695, %v627_v8 }
 0x50f   :  { %v608_v20 = vcvt.s32.f32 %v606_v15  ;;  %vm675_vm5 = vcmp.eq.s32.totalorder %v1482_v25, %v673_v61 }
 0x510   :  { %1182 = vpow2.f32 %v630_v9 }
 0x511   :  { %1184 = vpow2.f32 %v632_v10 }
 0x512   :  { %610 = vmin.xlane.f32.xlu0 %v609_v3 }
 0x516   :  { %624 = vmax.xlane.f32.xlu0 %v623_v4 }
 0x51a   :  { %v1183_v16 = vpop.eup %1182 }
 0x51b   :  { %v1185_v17 = vpop.eup %1184 }
 0x51c   :  { %v638_v21 = vadd.f32 %v1185_v17, %v1183_v16 }
 0x59b   :  { %v595_v13 = vpop.xlane.xlu0 %594 }
 0x59c   :  { %vm596_vm8 = vcmp.eq.f32.partialorder %v593_v63, %v595_v13  ;;  %v601_v34 = vcvt.f32.s32 %v595_v13 }
 0x59d   :  { %v597_v18 = vsel %vm596_vm8, %v592_v14, inf }
 0x59e   :  { %598 = vmin.xlane.f32.xlu1 %v597_v18  ;;  %v602_v37 = vshll.u32 %v601_v34, 16 }
 0x59f   :  { %v611_v19 = vpop.xlane.xlu0 %610 }
 0x5a0   :  { %vm612_vm9 = vcmp.eq.f32.partialorder %v609_v3, %v611_v19  ;;  %v617_v38 = vcvt.f32.s32 %v611_v19 }
 0x5a1   :  { %v613_v22 = vsel %vm612_vm9, %v608_v20, inf }
 0x5a2   :  { %614 = vmin.xlane.f32.xlu0 %v613_v22  ;;  %639 = vadd.xlane.f32.xlu1 %v638_v21  ;;  %v618_v45 = vshll.u32 %v617_v38, 16  ;;  %v691_v21 = vld [vmem:[#allocation7 + $0x20] sm:$0xff] }
 0x5a3   :  { %v625_v23 = vpop.xlane.xlu0 %624  ;;  %v1095_v22 = vpack.c.bf16 %v691_v21, %v690_v28 }
 0x5a4   :  { %v628_v24 = vsub.f32 %v1519_v42, %v625_v23  ;;  %v629_v26 = vsub.f32 %v1523_v47, %v625_v23 }
 0x5a6   :  { %v634_v27 = vmul.f32 1.442695, %v628_v24  ;;  %v636_v30 = vmul.f32 1.442695, %v629_v26  ;;  %v694_v24 = vld [vmem:[#allocation7 + $0x10] sm:$0xff]  ;;  %v695_v26 = vld [vmem:[#allocation7 + $0x28] sm:$0xff] }
 0x5a8   :  { %1186 = vpow2.f32 %v634_v27 }
 0x5a9   :  { %1188 = vpow2.f32 %v636_v30  ;;  %v1098_v30 = vpack.c.bf16 %v695_v26, %v694_v24 }
 0x5b2   :  { %v1187_v31 = vpop.eup %1186 }
 0x5b3   :  { %v1189_v32 = vpop.eup %1188 }
 0x5b4   :  { %v641_v33 = vadd.f32 %v1189_v32, %v1187_v31  ;;  %v696_v32 = vld [vmem:[#allocation7 + $0x40] sm:$0xff] }
 0x5b6   :  { %642 = vadd.xlane.f32.xlu0 %v641_v33  ;;  %v697_v33 = vld [vmem:[#allocation7 + $0x58] sm:$0xff] }
 0x5b7   :  { %v1101_v34 = vpack.c.bf16 %v697_v33, %v696_v32 }
 0x62b   :  { %v599_v36 = vpop.xlane.xlu1 %598 }
 0x62c   :  { %v600_v40 = vcvt.f32.s32 %v599_v36  ;;  %v698_v36 = vld [vmem:[#allocation7 + $0x70] sm:$0xff] }
 0x62e   :  { %v603_v41 = vadd.s32 %v602_v37, %v600_v40  ;;  %v699_v37 = vld [vmem:[#allocation7 + $0x88] sm:$0xff]  ;;  %v851_v40 = vsub.s32 2, %v1466_v5 }
 0x62f   :  { %v615_v44 = vpop.xlane.xlu0 %614  ;;  %v1104_v38 = vpack.c.bf16 %v699_v37, %v698_v36 }
 0x630   :  { %v616_v46 = vcvt.f32.s32 %v615_v44  ;;  %vm650_vm11 = vcmp.eq.s32.totalorder %v1482_v25, %v603_v41  ;;  %vm651_vm12 = vcmp.eq.s32.totalorder %v1488_v29, %v603_v41  ;;  %v668_v62 = vcvt.s32.f32 %v603_v41  ;;  %v700_v44 = vld [vmem:[#allocation7 + $0xa0] sm:$0xff] }
 0x631   :  { %v654_v48 = vsel %vm650_vm11, %v1514_v35, 0.0  ;;  %v655_v49 = vsel %vm651_vm12, %v1516_v39, 0.0  ;;  %v693_v35 = vld [vmem:[#allocation7 + $0x50] sm:$0xff]  ;;  %v640_v39 = vpop.xlane.xlu1 %639  ;;  %v852_v41 = vrot.slane %v1473_v11, %v851_v40 }
 0x632   :  { %v619_v50 = vadd.s32 %v618_v45, %v616_v46  ;;  %v658_v51 = vadd.f32 %v655_v49, %v654_v48  ;;  %v1092_v56 = vpack.c.bf16 %v693_v35, %v692_v55  ;;  %1190 = vlog2.f32 %v640_v39 }
 0x634   :  { %659 = vadd.xlane.f32.xlu1 %v658_v51  ;;  %vm652_vm13 = vcmp.eq.s32.totalorder %v1482_v25, %v619_v50  ;;  %vm653_vm14 = vcmp.eq.s32.totalorder %v1488_v29, %v619_v50  ;;  %1093 = vmatpush3.bf16.msra.mxu0 %v1092_v56  ;;  %v669_v4 = vcvt.s32.f32 %v619_v50 }
 0x635   :  { %v656_v52 = vsel %vm652_vm13, %v1519_v42, 0.0  ;;  %v657_v53 = vsel %vm653_vm14, %v1523_v47, 0.0  ;;  %1094 = vmatprep.subr.bf16.mxu0 %v1345_v0  ;;  %v672_v47 = vadd.s32 16, %v1466_v5 }
 0x636   :  { %v661_v54 = vadd.f32 %v657_v53, %v656_v52  ;;  %v671_v10 = vsel %vm667_vm4, %v669_v4, 0.0 }
 0x637   :  { %vm674_vm15 = vcmp.eq.s32.totalorder %v1482_v25, %v672_v47 }
 0x638   :  { %662 = vadd.xlane.f32.xlu0 %v661_v54 }
 0x63c   :  { %v1191_v29 = vpop.eup %1190 }
 0x63d   :  { %v645_v58 = vmul.f32 0.6931472, %v1191_v29 }
 0x63f   :  { %v648_v60 = vadd.f32 %v645_v58, %v1538_v6  ;;  %v670_v6 = vsel %vm666_vm3, %v668_v62, 0.0 }
 0x643   :  { %v643_v57 = vpop.xlane.xlu0 %642 }
 0x644   :  { %1192 = vlog2.f32 %v643_v57 }
 0x645   :  { %775 = vrot.lane.b32.xlu1 %v1497_v43, %s1351_s16 }
 0x64e   :  { %v1193_v42 = vpop.eup %1192  ;;  %856 = vrot.lane.b32.xlu0 %v852_v41, %s1348_s15 }
 0x64f   :  { %v647_v59 = vmul.f32 0.6931472, %v1193_v42 }
 0x651   :  { %v649_v3 = vadd.f32 %v647_v59, %v625_v23 }
 0x6c1   :  { %v660_v43 = vpop.xlane.xlu1 %659 }
 0x6c2   :  { %v664_v63 = vsub.f32 %v660_v43, %v648_v60 }
 0x6c4   :  { %v676_v2 = vsel %vm674_vm15, %v664_v63, 0.0 }
 0x6c5   :  { %v663_v7 = vpop.xlane.xlu0 %662  ;;  %v678_v9 = vadd.f32 %v676_v2, %v670_v6  ;;  %v776_v31 = vpop.permute.xlu1 %775 }
 0x6c6   :  { %v665_v8 = vsub.f32 %v663_v7, %v649_v3 }
 0x6c7   :  { %v681_v14 = vsel %vm680_vm6, %v678_v9, 0.0 }
 0x6c8   :  { %v677_v12 = vsel %vm675_vm5, %v665_v8, 0.0 }
 0x6c9   :  { %v679_v13 = vadd.f32 %v677_v12, %v671_v10  ;;  %v857_v5 = vpop.permute.xlu0 %856 }
 0x6cb   :  { %v682_v15 = vsel %vm680_vm6, %v679_v13, 0.0 }
 0x6cc   :  { %v683_v16 = vadd.f32 %v682_v15, %v681_v14 }
 0x6ce   :  { %v684_v17 = vrot.slane %v683_v16, 4 }
 0x6d0   :  { %v685_v18 = vadd.f32 %v684_v17, %v683_v16 }
 0x6d2   :  { %v686_v19 = vrot.slane %v685_v18, 2 }
 0x6d4   :  { %v687_v20 = vadd.f32 %v686_v19, %v685_v18 }
 0x6d6   :  { %v688_v25 = vrot.slane %v687_v20, 1 }
 0x6d8   :  { %v689_v23 = vadd.f32 %v688_v25, %v687_v20 }
 0x6da   :  { %1056 = vmatmul.mubr.msk.f32.vlgmr.msra.gmra.mrb[4].mxu0 %vm239_vm10, %v689_v23  ;;  %v933_v27 = vsel %vm680_vm6, %v689_v23, 0.0 }
 0x6db   :  { %1096 = vmatpush3.bf16.msra.mxu0 %v1095_v22  ;;  %1062 = vmatprep.mubr.msk.f32.mxu0 %vm1347_vm2, %v1346_v1 }
 0x6dc   :  { %1097 = vmatprep.subr.bf16.mxu0 %v1345_v0 }
 0x6de   :  { %1063 = vmatmul.mubr.msk.f32.vlgmr.msra.gmra.mrb[6].mxu0 %vm239_vm10, %v776_v31  ;;  %vm934_vm10 = vcmask 23552  }
 0x6df   :  { %1099 = vmatpush3.bf16.msra.mxu0 %v1098_v30  ;;  %1081 = vmatprep.mubr.msk.f32.mxu0 %vm1347_vm2, %v1346_v1  ;;  %v701_v1 = vld [vmem:[#allocation7 + $0xb8] sm:$0xff]  ;;  %vm859_vm2 = vcmask 523264  }
 0x6e0   :  { %1100 = vmatprep.subr.bf16.mxu0 %v1345_v0  ;;  %v1107_v45 = vpack.c.bf16 %v701_v1, %v700_v44 }
 0x6e3   :  { %1102 = vmatpush3.bf16.msra.mxu0 %v1101_v34 }
 0x6e4   :  { %1103 = vmatprep.subr.bf16.mxu0 %v1345_v0 }
 0x6e7   :  { %1105 = vmatpush3.bf16.msra.mxu0 %v1104_v38 }
 0x6e8   :  { %1106 = vmatprep.subr.bf16.mxu0 %v1345_v0 }
 0x6eb   :  { %1108 = vmatpush3.bf16.msra.mxu0 %v1107_v45 }
 0x7ad   :  { %v771_v46 = vpop.f32.mrb[4].mxu0 }
 0x7ae   :  { %v1057_v48 = vpop.f32.mrb[5].mxu0 }
 0x7b1   :  { %v845_v49 = vpop.f32.mrb[6].mxu0 }
 0x7b2   :  { %v846_v50 = vadd.f32 %v845_v49, %v771_v46  ;;  %v1064_v51 = vpop.f32.mrb[7].mxu0 }
 0x7b4   :  { %v854_v52 = vadd.f32 %v852_v41, %v846_v50 }
 0x7b6   :  { %v855_v53 = vmax.f32 %v854_v52, 0.0 }
 0x7b8   :  { %1082 = vmatmul.mubr.msk.f32.vlgmr.msra.gmra.mrb[8].mxu0 %vm859_vm2, %v855_v53 }
 0x88b   :  { %v929_v54 = vpop.f32.mrb[8].mxu0 }
 0x88c   :  { %v930_v11 = vadd.f32 %v929_v54, %v857_v5  ;;  %v1083_v0 = vpop.f32.mrb[9].mxu0 }
 0x88e   :  { %v935_v55 = vsel %vm934_vm10, %v930_v11, 0.0 }
 0x88f   :  { %v938_v35 = vrot.slane %v935_v55, 7 }
 0x891   :  { %v942_v56 = vsel %vm99_vm1, %v933_v27, %v938_v35 }
 0x892   :  { %v945_v39 = vsel %vm944_vm0, %v942_v56, 0.0 }
 0x893   :  { %951 = vst [vmem:[#allocation11 + $0x20] sm:$0xff] %v945_v39 }
 0x894   :  { %1315 = shalt.err (!%p1312_p2)
}
 0x895   :  { %s1316_s21 = scalar_lea.hbm %s1604_s6, 768 }
 0x896   :  { %p1317_p3 = scmp.ne.s32.totalorder %s1604_s6, %s1316_s21  ;;  %p1320_p4 = scmp.lt.u32.totalorder %s1316_s21, %s1604_s6 }
 0x898   :  { %p1322_p5 = pnand %p1320_p4, %p1317_p3 }
 0x89a   :  { %1325 = shalt.err (!%p1322_p5)
}
 0x89b   :  { %964 = dma.vmem_to_hbm [thread:$0]  %s959_s18, 768, %s1604_s6, [#allocation4], %s1335_s7, %s1335_s7, %s1336_s8  }
 0x89c   :  { %1332 = dma.done.wait [#allocation4], 768  }
 0x89d   :  { %1333 = vsyncadd [#allocation4], 4294966528 }
 0x89e   :  { %968 = vsyncpa [#allocation3], 1 }
 0x89f   :  { %969 = vsyncpa [#allocation6], 1 }
 0x8a0   :  { %970 = vsyncpa [#allocation9], 1 }
 0x8a1   :  { %971 = vsyncpa [#allocation4], 1 }

</bundles_post_ra>
